<compile_context>
chip_gen: v6e
topology: v6e:2x2x1
jax: 0.10.0
libtpu: 0.0.40
codegen_flags: <defaults>
</compile_context>

<pallas_src>
import jax
import jax.numpy as jnp
from jax.experimental import pallas as pl
from jax.experimental.pallas import tpu as pltpu

_C1 = 0.7978845608028654              # sqrt(2 / pi)
_C2 = 0.7978845608028654 * 0.044715   # sqrt(2 / pi) * 0.044715

_VMEM_LIMIT_BYTES = 48 * 1024 * 1024  # <= v7x 64 MiB physical; 4 x 6 MiB bufs fit
_SUBLANE_MULT = {4: 8, 2: 16, 1: 32}  # packed-sublane multiple per itemsize


def _gelu_kernel(x_ref, o_ref):
    # tanh-GELU: 0.5 * x * (1 + tanh(sqrt(2/pi) * (x + 0.044715 x^3)))
    # Folded:    x * (0.5 + 0.5 * tanh(x * (C1 + C2 * x^2)))
    # Computed in f32 (upcast is free for f32 inputs, explicit for bf16/f16);
    # tanh goes to the EUP slot, which is otherwise idle for this kernel.
    x = x_ref[...].astype(jnp.float32)
    inner = x * (_C1 + _C2 * (x * x))
    o_ref[...] = (x * (0.5 + 0.5 * jnp.tanh(inner))).astype(o_ref.dtype)


def _choose_lane_width(n):
    """Largest lane-dense width (multiple of 128) dividing n (n % 128 == 0)."""
    for c in (2048, 1024, 512, 256, 128):
        if n % c == 0:
            return c
    return 128  # unreachable when n % 128 == 0


def _pick_row_tile(rows, width, itemsize, target_block_bytes):
    """Row tile: ~target_block_bytes per block, aligned to the packed-sublane
    multiple of the dtype, and split so the grid has >= 2 steps when the slab
    is big enough to benefit from v7x's two TensorCores."""
    sub = _SUBLANE_MULT.get(itemsize, 8)
    if rows <= sub:
        return rows  # block second-minor dim equals the full array dim
    rows_target = max(sub, (target_block_bytes // (width * itemsize)) // sub * sub)
    row_tile = min(rows_target, rows)
    # Megacore: if everything fits in one block but the slab is non-trivial,
    # split it so the "parallel" grid axis can be sharded across both TCs.
    slab_bytes = rows * width * itemsize
    if row_tile == rows and rows >= 2 * sub and slab_bytes >= (1 << 20):
        half = -(-rows // 2)
        row_tile = -(-half // sub) * sub
    return row_tile


def _run_gelu_2d(x2d, row_tile):
    rows, width = x2d.shape
    grid = (pl.cdiv(rows, row_tile),)
    return pl.pallas_call(
        _gelu_kernel,
        out_shape=jax.ShapeDtypeStruct((rows, width), x2d.dtype),
        grid_spec=pltpu.PrefetchScalarGridSpec(
            num_scalar_prefetch=0,
            grid=grid,
            in_specs=[pl.BlockSpec((row_tile, width), lambda i: (i, 0))],
            out_specs=pl.BlockSpec((row_tile, width), lambda i: (i, 0)),
        ),
        compiler_params=pltpu.CompilerParams(
            dimension_semantics=("parallel",),
            vmem_limit_bytes=_VMEM_LIMIT_BYTES,
        ),
    )(x2d)


def gelu_pallas(x, *, target_block_bytes=6 * 1024 * 1024):
    """Tanh-approx GELU matching the PyTorch module's forward exactly."""
    orig_shape = x.shape
    n = x.size
    if n == 0:
        return x
    itemsize = jnp.dtype(x.dtype).itemsize

    if n % 128 == 0:
        # Fast path: lane-dense slab, multiple-of-128 lane width -> unmasked
        # full-lane stores, no padding at either end.
        lane_w = _choose_lane_width(n)
        rows = n // lane_w
        x2d = x.reshape(rows, lane_w)
        row_tile = _pick_row_tile(rows, lane_w, itemsize, target_block_bytes)
        return _run_gelu_2d(x2d, row_tile).reshape(orig_shape)

    # Ragged path (element count not a multiple of 128, rare for GPT shapes):
    # run on the natural (leading-collapsed, last-dim) view.  The block's lane
    # dim equals the full array dim, so no pad/slice/concat HBM passes are
    # introduced; the only cost is masked partial stores on the lane edge.
    if x.ndim >= 2:
        width = orig_shape[-1]
        rows = n // width
    else:
        width, rows = n, 1
    x2d = x.reshape(rows, width)
    row_tile = _pick_row_tile(rows, width, itemsize, target_block_bytes)
    return _run_gelu_2d(x2d, row_tile).reshape(orig_shape)


def gelu_reference(x):
    xf = x.astype(jnp.float32)
    y = 0.5 * xf * (1.0 + jnp.tanh(jnp.sqrt(2.0 / jnp.pi) * (xf + 0.044715 * xf ** 3)))
    return y.astype(x.dtype)


if __name__ == "__main__":
    key = jax.random.PRNGKey(0)
    k1, k2, k3 = jax.random.split(key, 3)

    # Small GPT-style activation: (batch=2, seq=8, hidden=32) -> (1, 512) slab.
    x = jax.random.normal(k1, (2, 8, 32), dtype=jnp.float32)
    y = jax.block_until_ready(gelu_pallas(x))
    assert y.shape == x.shape and y.dtype == x.dtype
    assert jnp.max(jnp.abs(y - gelu_reference(x))) < 1e-5

    # Element count not a multiple of 128 exercises the natural-shape ragged path.
    x2 = jax.random.normal(k2, (3, 7, 33), dtype=jnp.float32)
    y2 = jax.block_until_ready(gelu_pallas(x2))
    assert y2.shape == x2.shape and y2.dtype == x2.dtype
    assert jnp.max(jnp.abs(y2 - gelu_reference(x2))) < 1e-5

    # bf16 input: kernel upcasts to f32 internally (PyTorch half-precision opmath).
    x3 = jax.random.normal(k3, (2, 8, 256), dtype=jnp.bfloat16)
    y3 = jax.block_until_ready(gelu_pallas(x3))
    assert y3.shape == x3.shape and y3.dtype == x3.dtype
    assert jnp.max(jnp.abs(y3.astype(jnp.float32) -
                           gelu_reference(x3).astype(jnp.float32))) < 2e-2

    print("KERNEL_OK")
</pallas_src>

<mosaic_0001>
module attributes {stable_mosaic.version = 11 : i64} {
  func.func @_gelu_kernel(%arg0: i32, %arg1: memref<1x512xf32, #tpu.memory_space<vmem>>, %arg2: memref<1x512xf32, #tpu.memory_space<vmem>>) attributes {dimension_semantics = [#tpu.dimension_semantics<parallel>], iteration_bounds = array<i64: 1>, scalar_prefetch = 0 : i64, scratch_operands = 0 : i64, tpu.core_type = #tpu.core_type<tc>, window_params = [{transform_indices = @transform_0, window_bounds = array<i64: 1, 512>}, {transform_indices = @transform_1, window_bounds = array<i64: 1, 512>}]} {
    %c0 = arith.constant 0 : index
    %c0_0 = arith.constant 0 : index
    %0 = vector.load %arg1[%c0, %c0_0] : memref<1x512xf32, #tpu.memory_space<vmem>>, vector<1x512xf32>
    %1 = arith.mulf %0, %0 : vector<1x512xf32>
    %cst = arith.constant 0.0356774069 : f32
    %2 = vector.broadcast %cst : f32 to vector<1x512xf32>
    %3 = arith.mulf %2, %1 : vector<1x512xf32>
    %cst_1 = arith.constant 0.797884583 : f32
    %4 = vector.broadcast %cst_1 : f32 to vector<1x512xf32>
    %5 = arith.addf %4, %3 : vector<1x512xf32>
    %6 = arith.mulf %0, %5 : vector<1x512xf32>
    %7 = math.tanh %6 : vector<1x512xf32>
    %cst_2 = arith.constant 5.000000e-01 : f32
    %8 = vector.broadcast %cst_2 : f32 to vector<1x512xf32>
    %9 = arith.mulf %8, %7 : vector<1x512xf32>
    %cst_3 = arith.constant 5.000000e-01 : f32
    %10 = vector.broadcast %cst_3 : f32 to vector<1x512xf32>
    %11 = arith.addf %10, %9 : vector<1x512xf32>
    %12 = arith.mulf %0, %11 : vector<1x512xf32>
    %c0_4 = arith.constant 0 : index
    %c0_5 = arith.constant 0 : index
    %13 = vector.load %arg2[%c0_4, %c0_5] : memref<1x512xf32, #tpu.memory_space<vmem>>, vector<1x512xf32>
    tpu.vector_store %arg2[%c0_4, %c0_5], %12 {strides = array<i32>} : memref<1x512xf32, #tpu.memory_space<vmem>>, vector<1x512xf32>,
    return
  }
  func.func @transform_0(%arg0: i32) -> (i32, i32) {
    %c0_i32 = arith.constant 0 : i32
    %c0_i32_0 = arith.constant 0 : i32
    return %arg0, %c0_i32 : i32, i32
  }
  func.func @transform_1(%arg0: i32) -> (i32, i32) {
    %c0_i32 = arith.constant 0 : i32
    %c0_i32_0 = arith.constant 0 : i32
    return %arg0, %c0_i32 : i32, i32
  }
}

</mosaic_0001>

<bundles_post_ra>
// kernel: tpu_custom_call.1
= control target key start
LH: loop header
LB: loop body
LE: loop exit
PB: predicated region body
PF: predicated region fallthrough
CT: control target
= control target key end

     0   :  { %6 = vsyncpa [#allocation3], 0  ;;  %s116_s0 = inlined_call_operand.hbm [shape: f32[1,512], index: 0, kind: input, shape index: {}]   ;;  %s117_s1 = inlined_call_operand.hbm [shape: f32[1,512], index: 1, kind: output, shape index: {}]  }
   0x1   :  { %7 = vsyncpa [#allocation4], 0  ;;  %s98_s6 = smov [#allocation2]  }
   0x2   :  { %s14_s7 = sshll.u32 %s98_s6, 4  ;;  %s15_s7 = int_to_ptr.vmem [resolvable:$true] %s14_s7 }
   0x3   :  { %s62_s8 = scalar_lea.vmem %s15_s7, 64  ;;  %p67_p1 = scmp.lt.s32.totalorder %s15_s7, %s15_s7 }
   0x4   :  { %p63_p0 = scmp.ne.s32.totalorder %s15_s7, %s62_s8  ;;  %p68_p2 = scmp.lt.s32.totalorder %s62_s8, %s62_s8 }
   0x6   :  { %p69_p3 = por %p68_p2, %p67_p1 }
   0x8   :  { %p70_p4 = pnand %p69_p3, %p63_p0 }
   0xa   :  { %73 = shalt.err (!%p70_p4)
}
   0xb   :  { %17 = dma.hbm_to_vmem [thread:$0]  %s116_s0, 64, %s15_s7, [#allocation3]  }
   0xc   :  { %94 = dma.done.wait [#allocation3], 64  }
   0xd   :  { %95 = vsyncadd [#allocation3], 4294967232  ;;  %v21_v0 = vld [vmem:[#allocation2] sm:$0xf]  ;;  %v30_v6 = vlaneseq  ;;  %s99_s11 = smov [#allocation5]  }
   0xe   :  { %v22_v1 = vmul.f32 %v21_v0, %v21_v0  ;;  %s41_s12 = sshll.u32 %s99_s11, 4  ;;  %s42_s12 = int_to_ptr.vmem [resolvable:$true] %s41_s12 }
   0xf   :  { %vm32_vm0 = vcmp.lt.s32.totalorder %v30_v6, 512  ;;  %s74_s13 = scalar_lea.vmem %s42_s12, 64  ;;  %p79_p6 = scmp.lt.s32.totalorder %s42_s12, %s42_s12 }
  0x10   :  { %v23_v2 = vmul.f32 0.035677407, %v22_v1  ;;  %p75_p5 = scmp.ne.s32.totalorder %s42_s12, %s74_s13  ;;  %p80_p7 = scmp.lt.s32.totalorder %s74_s13, %s74_s13 }
  0x12   :  { %v24_v3 = vadd.f32 0.7978846, %v23_v2  ;;  %p81_p8 = por %p80_p7, %p79_p6 }
  0x14   :  { %v25_v4 = vmul.f32 %v24_v3, %v21_v0  ;;  %p82_p9 = pnand %p81_p8, %p75_p5 }
  0x16   :  { %52 = vtanh.f32 %v25_v4 }
  0x23   :  { %v53_v5 = vpop.eup %52 }
  0x24   :  { %v27_v7 = vmul.f32 0.5, %v53_v5 }
  0x26   :  { %v28_v8 = vadd.f32 0.5, %v27_v7 }
  0x28   :  { %v29_v9 = vmul.f32 %v28_v8, %v21_v0 }
  0x2a   :  { %34 = vst.msk [vmem:[#allocation5] sm:$0xf] %vm32_vm0, %v29_v9 }
  0x2b   :  { %85 = shalt.err (!%p82_p9)
}
  0x2c   :  { %44 = dma.vmem_to_hbm [thread:$0]  %s42_s12, 64, %s117_s1, [#allocation4]  }
  0x2d   :  { %96 = dma.done.wait [#allocation4], 64  }
  0x2e   :  { %97 = vsyncadd [#allocation4], 4294967232 }
  0x2f   :  { %48 = vsyncpa [#allocation3], 1 }
  0x30   :  { %49 = vsyncpa [#allocation4], 1 }

</bundles_post_ra>
